<compile_context>
chip_gen: v6e
topology: v6e:2x2x1
jax: 0.10.0
libtpu: 0.0.40
codegen_flags: <defaults>
</compile_context>

<pallas_src>
import jax
import jax.numpy as jnp
from jax.experimental import pallas as pl
from jax.experimental.pallas import tpu as pltpu


NUM_PATHS = 3
C_IN = 4
C_OUT = 8

# Lanes (pixels) per grid step.  65536 px  ->  1 MiB in (2 MiB after 4->8
# sublane padding) + 2 MiB out per block; ~8 MiB double-buffered, which fits
# the default scoped-VMEM budget on every generation while keeping the fixed
# ~0.35 us/step grid overhead <15% of the per-step HBM time.
MAX_TILE_PIX = 65536


def _round_up(x, m):
    return (x + m - 1) // m * m


def split_reduce_kernel(x_ref, w_ref, b_ref, o_ref):
    """out(bn, C_OUT, T) = W(C_OUT, C_IN) @ x(bn, C_IN, T) + b, on the VPU.

    x_ref: (bn, C_IN, T)   VMEM   pixels on the lane axis (lane dense)
    w_ref: (C_OUT, C_IN)   VMEM   path-summed 1x1-conv weights
    b_ref: (C_OUT, 1)      VMEM   path-summed biases
    o_ref: (bn, C_OUT, T)  VMEM
    """
    x = x_ref[...]                                  # (bn, C_IN, T) f32
    w = w_ref[...]                                  # (C_OUT, C_IN)
    b = b_ref[...]                                  # (C_OUT, 1)
    # K=4 contraction as 4 broadcast multiply-adds (VPU).  Accumulator is
    # initialized with channel 0's product plus the bias: no full-tile
    # broadcast of the bias and no redundant cast.
    acc = w[None, :, 0:1] * x[:, 0:1, :] + b[None, :, :]
    for ci in range(1, C_IN):
        acc = acc + w[None, :, ci:ci + 1] * x[:, ci:ci + 1, :]
    o_ref[...] = acc.astype(o_ref.dtype)


@jax.jit
def split_reduce(x_nchw, weights, biases):
    """x_nchw:  (N, C_IN, H, W) float32
    weights:   (NUM_PATHS, C_OUT, C_IN)  per-path 1x1-conv weights (PyTorch order)
    biases:    (NUM_PATHS, C_OUT)        per-path biases
    returns:   (N, C_OUT, H, W) float32  ==  sum_p conv1x1_p(x)
    """
    n, c_in, h, w = x_nchw.shape
    assert c_in == C_IN
    hw = h * w

    # reduce == sum  =>  fold the paths into one set of parameters (exact up to
    # FP summation order).
    w_sum = jnp.sum(weights, axis=0)                      # (C_OUT, C_IN)
    b_sum = jnp.sum(biases, axis=0)[:, None]              # (C_OUT, 1)

    # NCHW is already contiguous as (N, C, H*W): free reshape, no transposes.
    x_flat = x_nchw.reshape(n, C_IN, hw)

    # Tiling policy:
    #  * large images: tile the pixel axis with MAX_TILE_PIX-lane blocks
    #    (multiple of 128); the trailing partial block is masked by Pallas —
    #    no host-side pad, no output slice, no garbage pixels computed.
    #  * small images: one block spans the whole pixel axis and folds several
    #    batch images (bn) into a grid step so each step still moves ~MiBs.
    if hw >= MAX_TILE_PIX:
        tile_pix = MAX_TILE_PIX
        bn = 1
    else:
        tile_pix = hw                                     # full dim => always legal
        hw_vmem = _round_up(max(hw, 1), 128)              # lane-padded footprint
        bn = max(1, min(n, MAX_TILE_PIX // hw_vmem))
    grid = (pl.cdiv(n, bn), pl.cdiv(hw, tile_pix))

    dsize = jnp.dtype(jnp.float32).itemsize
    cost = pl.CostEstimate(
        flops=2 * n * hw * C_IN * C_OUT,
        transcendentals=0,
        bytes_accessed=n * hw * (C_IN + C_OUT) * dsize,
    )

    out_flat = pl.pallas_call(
        split_reduce_kernel,
        out_shape=jax.ShapeDtypeStruct((n, C_OUT, hw), jnp.float32),
        grid_spec=pltpu.PrefetchScalarGridSpec(
            num_scalar_prefetch=0,
            grid=grid,
            in_specs=[
                pl.BlockSpec((bn, C_IN, tile_pix), lambda i, j: (i, 0, j)),
                pl.BlockSpec((C_OUT, C_IN), lambda i, j: (0, 0)),
                pl.BlockSpec((C_OUT, 1), lambda i, j: (0, 0)),
            ],
            out_specs=pl.BlockSpec((bn, C_OUT, tile_pix), lambda i, j: (i, 0, j)),
        ),
        compiler_params=pltpu.CompilerParams(
            dimension_semantics=("parallel", "parallel"),
            vmem_limit_bytes=32 * 1024 * 1024,
        ),
        cost_estimate=cost,
    )(x_flat, w_sum, b_sum)

    return out_flat.reshape(n, C_OUT, h, w)


def _reference(x_nchw, weights, biases):
    # Pure-JAX reference of the original module: per-path 1x1 conv, then sum.
    n, c_in, h, w = x_nchw.shape
    x_flat = x_nchw.reshape(n, c_in, h * w)
    outs = [
        jnp.einsum("oc,ncp->nop", weights[p], x_flat) + biases[p][None, :, None]
        for p in range(NUM_PATHS)
    ]
    acc = outs[0]
    for o in outs[1:]:
        acc = acc + o
    return acc.reshape(n, C_OUT, h, w)


if __name__ == "__main__":
    key = jax.random.PRNGKey(0)
    kx, kw, kb = jax.random.split(key, 3)

    # deterministic synthetic parameters (one 1x1 conv per path, PyTorch layout)
    weights = 0.1 * jax.random.normal(kw, (NUM_PATHS, C_OUT, C_IN), jnp.float32)
    biases = 0.01 * jax.random.normal(kb, (NUM_PATHS, C_OUT), jnp.float32)

    # small NCHW input, matching the PyTorch convention
    x = jax.random.normal(kx, (2, C_IN, 16, 16), jnp.float32)

    out = split_reduce(x, weights, biases)
    jax.block_until_ready(out)

    ref = _reference(x, weights, biases)
    assert out.shape == (2, C_OUT, 16, 16)
    assert jnp.allclose(out, ref, atol=1e-5, rtol=1e-5)

    print("KERNEL_OK")
</pallas_src>

<mosaic_0001>
module attributes {stable_mosaic.version = 11 : i64} {
  func.func @split_reduce_kernel(%arg0: i32, %arg1: i32, %arg2: memref<2x4x256xf32, #tpu.memory_space<vmem>>, %arg3: memref<8x4xf32, #tpu.memory_space<vmem>>, %arg4: memref<8x1xf32, #tpu.memory_space<vmem>>, %arg5: memref<2x8x256xf32, #tpu.memory_space<vmem>>) attributes {dimension_semantics = [#tpu.dimension_semantics<parallel>, #tpu.dimension_semantics<parallel>], iteration_bounds = array<i64: 1, 1>, scalar_prefetch = 0 : i64, scratch_operands = 0 : i64, tpu.core_type = #tpu.core_type<tc>, window_params = [{transform_indices = @transform_0, window_bounds = array<i64: 2, 4, 256>}, {pipeline_mode = #tpu.pipeline_mode<synchronous>, transform_indices = @transform_1, window_bounds = array<i64: 8, 4>}, {pipeline_mode = #tpu.pipeline_mode<synchronous>, transform_indices = @transform_2, window_bounds = array<i64: 8, 1>}, {transform_indices = @transform_3, window_bounds = array<i64: 2, 8, 256>}]} {
    %c0 = arith.constant 0 : index
    %c0_0 = arith.constant 0 : index
    %c0_1 = arith.constant 0 : index
    %0 = vector.load %arg2[%c0, %c0_0, %c0_1] : memref<2x4x256xf32, #tpu.memory_space<vmem>>, vector<2x4x256xf32>
    %c0_2 = arith.constant 0 : index
    %c0_3 = arith.constant 0 : index
    %1 = vector.load %arg3[%c0_2, %c0_3] : memref<8x4xf32, #tpu.memory_space<vmem>>, vector<8x4xf32>
    %c0_4 = arith.constant 0 : index
    %c0_5 = arith.constant 0 : index
    %2 = vector.load %arg4[%c0_4, %c0_5] : memref<8x1xf32, #tpu.memory_space<vmem>>, vector<8x1xf32>
    %3 = vector.extract_strided_slice %1 {offsets = [0, 0], sizes = [8, 1], strides = [1, 1]} : vector<8x4xf32> to vector<8x1xf32>
    %4 = vector.shape_cast %3 : vector<8x1xf32> to vector<1x8x1xf32>
    %5 = vector.extract_strided_slice %0 {offsets = [0, 0, 0], sizes = [2, 1, 256], strides = [1, 1, 1]} : vector<2x4x256xf32> to vector<2x1x256xf32>
    %6 = vector.broadcast %4 : vector<1x8x1xf32> to vector<2x8x256xf32>
    %7 = vector.broadcast %5 : vector<2x1x256xf32> to vector<2x8x256xf32>
    %8 = arith.mulf %6, %7 : vector<2x8x256xf32>
    %9 = vector.shape_cast %2 : vector<8x1xf32> to vector<1x8x1xf32>
    %10 = vector.broadcast %9 : vector<1x8x1xf32> to vector<2x8x256xf32>
    %11 = arith.addf %8, %10 : vector<2x8x256xf32>
    %12 = vector.extract_strided_slice %1 {offsets = [0, 1], sizes = [8, 1], strides = [1, 1]} : vector<8x4xf32> to vector<8x1xf32>
    %13 = vector.shape_cast %12 : vector<8x1xf32> to vector<1x8x1xf32>
    %14 = vector.extract_strided_slice %0 {offsets = [0, 1, 0], sizes = [2, 1, 256], strides = [1, 1, 1]} : vector<2x4x256xf32> to vector<2x1x256xf32>
    %15 = vector.broadcast %13 : vector<1x8x1xf32> to vector<2x8x256xf32>
    %16 = vector.broadcast %14 : vector<2x1x256xf32> to vector<2x8x256xf32>
    %17 = arith.mulf %15, %16 : vector<2x8x256xf32>
    %18 = arith.addf %11, %17 : vector<2x8x256xf32>
    %19 = vector.extract_strided_slice %1 {offsets = [0, 2], sizes = [8, 1], strides = [1, 1]} : vector<8x4xf32> to vector<8x1xf32>
    %20 = vector.shape_cast %19 : vector<8x1xf32> to vector<1x8x1xf32>
    %21 = vector.extract_strided_slice %0 {offsets = [0, 2, 0], sizes = [2, 1, 256], strides = [1, 1, 1]} : vector<2x4x256xf32> to vector<2x1x256xf32>
    %22 = vector.broadcast %20 : vector<1x8x1xf32> to vector<2x8x256xf32>
    %23 = vector.broadcast %21 : vector<2x1x256xf32> to vector<2x8x256xf32>
    %24 = arith.mulf %22, %23 : vector<2x8x256xf32>
    %25 = arith.addf %18, %24 : vector<2x8x256xf32>
    %26 = vector.extract_strided_slice %1 {offsets = [0, 3], sizes = [8, 1], strides = [1, 1]} : vector<8x4xf32> to vector<8x1xf32>
    %27 = vector.shape_cast %26 : vector<8x1xf32> to vector<1x8x1xf32>
    %28 = vector.extract_strided_slice %0 {offsets = [0, 3, 0], sizes = [2, 1, 256], strides = [1, 1, 1]} : vector<2x4x256xf32> to vector<2x1x256xf32>
    %29 = vector.broadcast %27 : vector<1x8x1xf32> to vector<2x8x256xf32>
    %30 = vector.broadcast %28 : vector<2x1x256xf32> to vector<2x8x256xf32>
    %31 = arith.mulf %29, %30 : vector<2x8x256xf32>
    %32 = arith.addf %25, %31 : vector<2x8x256xf32>
    %c0_6 = arith.constant 0 : index
    %c0_7 = arith.constant 0 : index
    %c0_8 = arith.constant 0 : index
    %33 = vector.load %arg5[%c0_6, %c0_7, %c0_8] : memref<2x8x256xf32, #tpu.memory_space<vmem>>, vector<2x8x256xf32>
    tpu.vector_store %arg5[%c0_6, %c0_7, %c0_8], %32 {strides = array<i32>} : memref<2x8x256xf32, #tpu.memory_space<vmem>>, vector<2x8x256xf32>,
    return
  }
  func.func @transform_0(%arg0: i32, %arg1: i32) -> (i32, i32, i32) {
    %c0_i32 = arith.constant 0 : i32
    %c0_i32_0 = arith.constant 0 : i32
    return %arg0, %c0_i32, %arg1 : i32, i32, i32
  }
  func.func @transform_1(%arg0: i32, %arg1: i32) -> (i32, i32) {
    %c0_i32 = arith.constant 0 : i32
    %c0_i32_0 = arith.constant 0 : i32
    %c0_i32_1 = arith.constant 0 : i32
    return %c0_i32, %c0_i32_0 : i32, i32
  }
  func.func @transform_2(%arg0: i32, %arg1: i32) -> (i32, i32) {
    %c0_i32 = arith.constant 0 : i32
    %c0_i32_0 = arith.constant 0 : i32
    %c0_i32_1 = arith.constant 0 : i32
    return %c0_i32, %c0_i32_0 : i32, i32
  }
  func.func @transform_3(%arg0: i32, %arg1: i32) -> (i32, i32, i32) {
    %c0_i32 = arith.constant 0 : i32
    %c0_i32_0 = arith.constant 0 : i32
    return %arg0, %c0_i32, %arg1 : i32, i32, i32
  }
}

</mosaic_0001>

<bundles_post_ra>
// kernel: split_reduce.1
= control target key start
LH: loop header
LB: loop body
LE: loop exit
PB: predicated region body
PF: predicated region fallthrough
CT: control target
= control target key end

     0   :  { %v234_v0 = vmov 0   ;;  %v235_v1 = vmov 1   ;;  %v236_v4 = vmov 2   ;;  %v237_v5 = vmov 3   ;;  %s290_s1 = inlined_call_operand.vmem [shape: f32[8,4], index: 1, kind: input, shape index: {}]   ;;  %s291_s2 = inlined_call_operand.vmem [shape: f32[8,1], index: 2, kind: input, shape index: {}]   ;;  %s292_s0 = inlined_call_operand.vmem [shape: f32[2,4,256], index: 0, kind: input, shape index: {}]   ;;  %s293_s3 = inlined_call_operand.vmem [shape: f32[2,8,256], index: 3, kind: output, shape index: {}]  }
   0x1   :  { %230 = vset.pattern.permute.xlu0 %v234_v0  ;;  %231 = vset.pattern.permute.xlu1 %v235_v1  ;;  %v16_v2 = vld [vmem:[%s290_s1] sm:$0xff]  ;;  %v25_v6 = vlaneseq  ;;  %v15_v11 = vld [vmem:[%s292_s0 + $0x8] sm:$0xff] }
   0x2   :  { %20 = vperm.xlu0 %230, %v16_v2   ;;  %75 = vperm.xlu1 %231, %v16_v2   ;;  %v17_v3 = vld [vmem:[%s291_s2] sm:$0xff] }
   0x3   :  { %v26_v7 = vshrl.u32 %v25_v6, 7  ;;  %v14_v10 = vld [vmem:[%s292_s0] sm:$0xff] }
   0x5   :  { %v27_v8 = vsub.s32 0, %v26_v7  ;;  %v31_v9 = vsub.s32 4, %v26_v7  ;;  %v80_v12 = vsub.s32 1, %v26_v7  ;;  %v84_v13 = vsub.s32 5, %v26_v7 }
   0x6   :  { %67 = vperm.xlu0 %230, %v17_v3   ;;  %232 = vset.pattern.permute.xlu1 %v236_v4  ;;  %v128_v14 = vsub.s32 2, %v26_v7  ;;  %v132_v15 = vsub.s32 6, %v26_v7  ;;  %v270_v16 = vsub.s32 3, %v26_v7  ;;  %v180_v17 = vsub.s32 7, %v26_v7 }
   0x7   :  { %123 = vperm.xlu1 %232, %v16_v2   ;;  %v28_v18 = vrot.slane %v14_v10, %v27_v8  ;;  %v32_v19 = vrot.slane %v14_v10, %v31_v9  ;;  %v36_v20 = vrot.slane %v15_v11, %v27_v8  ;;  %v40_v21 = vrot.slane %v15_v11, %v31_v9 }
   0x8   :  { %v81_v22 = vrot.slane %v14_v10, %v80_v12  ;;  %v85_v23 = vrot.slane %v14_v10, %v84_v13  ;;  %v89_v24 = vrot.slane %v15_v11, %v80_v12  ;;  %v93_v25 = vrot.slane %v15_v11, %v84_v13 }
   0x9   :  { %v129_v26 = vrot.slane %v14_v10, %v128_v14  ;;  %v133_v27 = vrot.slane %v14_v10, %v132_v15  ;;  %v137_v28 = vrot.slane %v15_v11, %v128_v14  ;;  %v141_v29 = vrot.slane %v15_v11, %v132_v15 }
   0xa   :  { %233 = vset.pattern.permute.xlu0 %v237_v5  ;;  %v177_v30 = vrot.slane %v14_v10, %v270_v16  ;;  %v181_v31 = vrot.slane %v14_v10, %v180_v17  ;;  %v185_v32 = vrot.slane %v15_v11, %v270_v16  ;;  %v189_v33 = vrot.slane %v15_v11, %v180_v17 }
   0xb   :  { %171 = vperm.xlu0 %233, %v16_v2   ;;  %v48_v34 = vrot.slane %v28_v18, %v27_v8  ;;  %v52_v35 = vrot.slane %v32_v19, %v27_v8  ;;  %v56_v36 = vrot.slane %v36_v20, %v27_v8  ;;  %v60_v37 = vrot.slane %v40_v21, %v27_v8 }
   0xc   :  { %v101_v40 = vrot.slane %v81_v22, %v80_v12  ;;  %v105_v41 = vrot.slane %v85_v23, %v80_v12  ;;  %v109_v42 = vrot.slane %v89_v24, %v80_v12  ;;  %v113_v43 = vrot.slane %v93_v25, %v80_v12 }
   0xd   :  { %v149_v44 = vrot.slane %v129_v26, %v128_v14  ;;  %v153_v45 = vrot.slane %v133_v27, %v128_v14  ;;  %v157_v46 = vrot.slane %v137_v28, %v128_v14  ;;  %v161_v47 = vrot.slane %v141_v29, %v128_v14 }
   0xe   :  { %v197_v48 = vrot.slane %v177_v30, %v270_v16  ;;  %v201_v49 = vrot.slane %v181_v31, %v270_v16  ;;  %v205_v50 = vrot.slane %v185_v32, %v270_v16  ;;  %v209_v51 = vrot.slane %v189_v33, %v270_v16 }
  0x7d   :  { %v21_v38 = vpop.permute.xlu0 %20  ;;  %v76_v39 = vpop.permute.xlu1 %75 }
  0x7e   :  { %v61_v52 = vmul.f32 %v48_v34, %v21_v38  ;;  %v62_v53 = vmul.f32 %v52_v35, %v21_v38  ;;  %v63_v54 = vmul.f32 %v56_v36, %v21_v38  ;;  %v64_v55 = vmul.f32 %v60_v37, %v21_v38 }
  0x7f   :  { %v114_v56 = vmul.f32 %v101_v40, %v76_v39  ;;  %v115_v57 = vmul.f32 %v105_v41, %v76_v39  ;;  %v116_v58 = vmul.f32 %v109_v42, %v76_v39  ;;  %v117_v59 = vmul.f32 %v113_v43, %v76_v39 }
  0x81   :  { %v68_v60 = vpop.permute.xlu0 %67 }
  0x82   :  { %v70_v61 = vadd.f32 %v68_v60, %v61_v52  ;;  %v71_v62 = vadd.f32 %v68_v60, %v62_v53  ;;  %v72_v63 = vadd.f32 %v68_v60, %v63_v54  ;;  %v73_v0 = vadd.f32 %v68_v60, %v64_v55  ;;  %v124_v1 = vpop.permute.xlu1 %123 }
  0x83   :  { %v162_v2 = vmul.f32 %v149_v44, %v124_v1  ;;  %v163_v3 = vmul.f32 %v153_v45, %v124_v1  ;;  %v164_v4 = vmul.f32 %v157_v46, %v124_v1  ;;  %v165_v5 = vmul.f32 %v161_v47, %v124_v1 }
  0x84   :  { %v118_v6 = vadd.f32 %v114_v56, %v70_v61  ;;  %v119_v7 = vadd.f32 %v115_v57, %v71_v62  ;;  %v120_v8 = vadd.f32 %v116_v58, %v72_v63  ;;  %v121_v9 = vadd.f32 %v117_v59, %v73_v0 }
  0x86   :  { %v166_v10 = vadd.f32 %v162_v2, %v118_v6  ;;  %v167_v11 = vadd.f32 %v163_v3, %v119_v7  ;;  %v168_v12 = vadd.f32 %v164_v4, %v120_v8  ;;  %v169_v13 = vadd.f32 %v165_v5, %v121_v9  ;;  %v172_v14 = vpop.permute.xlu0 %171 }
  0x87   :  { %v210_v15 = vmul.f32 %v197_v48, %v172_v14  ;;  %v211_v16 = vmul.f32 %v201_v49, %v172_v14  ;;  %v212_v17 = vmul.f32 %v205_v50, %v172_v14  ;;  %v213_v18 = vmul.f32 %v209_v51, %v172_v14 }
  0x89   :  { %v214_v19 = vadd.f32 %v210_v15, %v166_v10  ;;  %v215_v20 = vadd.f32 %v211_v16, %v167_v11  ;;  %v216_v21 = vadd.f32 %v212_v17, %v168_v12  ;;  %v217_v22 = vadd.f32 %v213_v18, %v169_v13 }
  0x8b   :  { %218 = vst [vmem:[%s293_s3] sm:$0xff] %v214_v19  ;;  %219 = vst [vmem:[%s293_s3 + $0x8] sm:$0xff] %v215_v20 }
  0x8c   :  { %220 = vst [vmem:[%s293_s3 + $0x10] sm:$0xff] %v216_v21  ;;  %221 = vst [vmem:[%s293_s3 + $0x18] sm:$0xff] %v217_v22 }

</bundles_post_ra>
